<compile_context>
chip_gen: v5e
topology: v5e:2x2
jax: 0.10.0
libtpu: 0.0.40
codegen_flags: <defaults>
</compile_context>

<pallas_src>
import functools

import jax
import jax.numpy as jnp
from jax.experimental import pallas as pl
from jax.experimental.pallas import tpu as pltpu


def _round_up(x: int, m: int) -> int:
    return ((x + m - 1) // m) * m


def _pick_tile(dim: int, candidates) -> tuple[int, int]:
    """Pick a tile from descending `candidates` minimizing the padded extent.

    Ties go to the larger tile (fewer grid steps / operand re-streams).
    Returns (tile, padded_extent).
    """
    best_t = candidates[0]
    best_p = _round_up(dim, best_t)
    for t in candidates[1:]:
        p = _round_up(dim, t)
        if p < best_p:
            best_t, best_p = t, p
    return best_t, best_p


# ---------------------------------------------------------------------------
# Kernels
# ---------------------------------------------------------------------------

def _single_k_kernel(x_ref, w_ref, b_ref, o_ref, *, round_dtype, cast_x):
    """Whole reduction in one step: dot + bias + AMP round, no accumulator."""
    x = x_ref[...]
    if cast_x:
        x = x.astype(round_dtype)          # AMP cast fused into the kernel
    y = jnp.dot(x, w_ref[...], preferred_element_type=jnp.float32)
    y = y + b_ref[...].astype(jnp.float32)
    o_ref[...] = y.astype(round_dtype).astype(o_ref.dtype)


def _acc_in_out_kernel(x_ref, w_ref, b_ref, o_ref, *, round_dtype, cast_x):
    """Multi-K, fp32 output: accumulate directly into the resident output tile."""
    k = pl.program_id(2)

    @pl.when(k == 0)
    def _():
        o_ref[...] = jnp.zeros_like(o_ref)

    x = x_ref[...]
    if cast_x:
        x = x.astype(round_dtype)
    o_ref[...] += jnp.dot(x, w_ref[...], preferred_element_type=jnp.float32)

    @pl.when(k == pl.num_programs(2) - 1)
    def _():
        y = o_ref[...] + b_ref[...].astype(jnp.float32)
        # Model output dtype is the AMP compute dtype; convert_to_fp32 casts back.
        o_ref[...] = y.astype(round_dtype).astype(o_ref.dtype)


def _acc_in_scratch_kernel(x_ref, w_ref, b_ref, o_ref, acc_ref, *,
                           round_dtype, cast_x):
    """Multi-K, non-fp32 output: fp32 VMEM scratch accumulator."""
    k = pl.program_id(2)

    @pl.when(k == 0)
    def _():
        acc_ref[...] = jnp.zeros_like(acc_ref)

    x = x_ref[...]
    if cast_x:
        x = x.astype(round_dtype)
    acc_ref[...] += jnp.dot(x, w_ref[...], preferred_element_type=jnp.float32)

    @pl.when(k == pl.num_programs(2) - 1)
    def _():
        y = acc_ref[...] + b_ref[...].astype(jnp.float32)
        o_ref[...] = y.astype(round_dtype).astype(o_ref.dtype)


# ---------------------------------------------------------------------------
# Wrapper
# ---------------------------------------------------------------------------

@functools.partial(jax.jit, static_argnames=("out_dtype", "compute_dtype"))
def _amp_linear(x_f32, w, b, *, out_dtype, compute_dtype):
    """AMP linear: y = round(round(x) @ w + b) cast to out_dtype."""
    N, d_in = x_f32.shape
    d_out = w.shape[1]

    # Adaptive, large tiles (minimize padding, keep tm >= 128 so MXU is fed).
    tm, Np = _pick_tile(N, (512, 256, 128))
    tn, Op = _pick_tile(d_out, (512, 256, 128))
    tk, Kp = _pick_tile(d_in, (1024, 512, 256, 128))

    ni, nj, nk = Np // tm, Op // tn, Kp // tk

    # v7x megacore: if the whole output is one tile, split d_out so both
    # TensorCores get a parallel block (neutral on single-TC v5e/v6e).
    if ni == 1 and nj == 1 and tn >= 256:
        tn //= 2
        Op = _round_up(d_out, tn)
        nj = Op // tn

    # Eliminate the wrapper-side fp32->bf16 HBM round trip when x is
    # re-streamed at most twice over d_out blocks: cast inside the kernel
    # (4*nj bytes/elem) instead of wrapper cast (6 + 2*nj bytes/elem).
    cast_in_kernel = nj <= 2
    x = x_f32 if cast_in_kernel else x_f32.astype(compute_dtype)

    # Zero padding is exact for matmul + bias; excess rows/cols sliced off below.
    if (Np, Kp) != (N, d_in):
        x = jnp.pad(x, ((0, Np - N), (0, Kp - d_in)))
    wp = w if (Kp, Op) == (d_in, d_out) else jnp.pad(
        w, ((0, Kp - d_in), (0, Op - d_out)))
    bp = b if Op == d_out else jnp.pad(b, ((0, 0), (0, Op - d_out)))

    itemsize = lambda dt: jnp.dtype(dt).itemsize
    cost = pl.CostEstimate(
        flops=2 * Np * Kp * Op,
        transcendentals=0,
        bytes_accessed=(Np * Kp * itemsize(x.dtype) * nj
                        + Kp * Op * itemsize(w.dtype) * ni
                        + Op * itemsize(b.dtype)
                        + Np * Op * itemsize(out_dtype)),
    )

    common = dict(round_dtype=compute_dtype, cast_x=cast_in_kernel)

    if nk == 1:
        # Single-K fast path: no accumulator, 2-D fully-parallel grid.
        kernel = functools.partial(_single_k_kernel, **common)
        grid = (ni, nj)
        in_specs = [
            pl.BlockSpec((tm, tk), lambda i, j: (i, 0)),   # x tile
            pl.BlockSpec((tk, tn), lambda i, j: (0, j)),   # weight tile
            pl.BlockSpec((1, tn), lambda i, j: (0, j)),    # bias tile
        ]
        out_specs = pl.BlockSpec((tm, tn), lambda i, j: (i, j))
        scratch_shapes = []
        dims = ("parallel", "parallel")
    else:
        grid = (ni, nj, nk)
        in_specs = [
            pl.BlockSpec((tm, tk), lambda i, j, k: (i, k)),   # x tile
            pl.BlockSpec((tk, tn), lambda i, j, k: (k, j)),   # weight tile
            pl.BlockSpec((1, tn), lambda i, j, k: (0, j)),    # bias tile
        ]
        out_specs = pl.BlockSpec((tm, tn), lambda i, j, k: (i, j))
        dims = ("parallel", "parallel", "arbitrary")
        if jnp.dtype(out_dtype) == jnp.dtype(jnp.float32):
            # Accumulate directly in the fp32 output tile: no scratch, no
            # epilogue copy, more VMEM headroom for larger tiles.
            kernel = functools.partial(_acc_in_out_kernel, **common)
            scratch_shapes = []
        else:
            kernel = functools.partial(_acc_in_scratch_kernel, **common)
            scratch_shapes = [pltpu.VMEM((tm, tn), jnp.float32)]

    out = pl.pallas_call(
        kernel,
        out_shape=jax.ShapeDtypeStruct((Np, Op), out_dtype),
        grid_spec=pltpu.PrefetchScalarGridSpec(
            num_scalar_prefetch=0,
            grid=grid,
            in_specs=in_specs,
            out_specs=out_specs,
            scratch_shapes=scratch_shapes,
        ),
        compiler_params=pltpu.CompilerParams(dimension_semantics=dims),
        cost_estimate=cost,
    )(x, wp, bp)

    if (Np, Op) != (N, d_out):
        out = out[:N, :d_out]
    return out


class NaiveAMPModel:
    """JAX/Pallas port of InternLM NaiveAMPModel wrapping a Linear model.

    world_size == 1 on a single device, so buffer synchronization
    (dist.all_reduce of module buffers) is disabled, exactly like the PyTorch
    module's `self._sync_buf = False` branch.  The AMP dtype defaults to
    bfloat16 (the TPU-native MXU operand type) instead of float16.
    """

    # TODO(synk): multi-rank buffer all-reduce (dist.all_reduce over the data
    # parallel group) is not implemented here — single device, world_size=1.

    def __init__(self, d_in, d_out, *, output_to_fp32=True,
                 dtype=jnp.bfloat16, key=None):
        if key is None:
            key = jax.random.PRNGKey(0)
        kw, kb = jax.random.split(key)
        # Deterministic "nn.Linear" parameters, then model.to(dtype).
        bound = 1.0 / (d_in ** 0.5)
        w_f32 = jax.random.uniform(kw, (d_in, d_out), jnp.float32, -bound, bound)
        b_f32 = jax.random.uniform(kb, (1, d_out), jnp.float32, -bound, bound)
        self.w = w_f32.astype(dtype)
        self.b = b_f32.astype(dtype)
        self._output_to_fp32 = output_to_fp32
        self.dtype = dtype
        self._world_size = 1
        self._sync_buf = False  # no process group on a single device

    def __call__(self, x):
        assert x.dtype == jnp.float32
        out_dtype = jnp.float32 if self._output_to_fp32 else self.dtype
        return _amp_linear(
            x, self.w, self.b,
            out_dtype=out_dtype, compute_dtype=self.dtype,
        )


def _reference_forward(x, w, b, compute_dtype, output_to_fp32):
    """Pure-JAX reference with identical AMP dtype flow."""
    xc = x.astype(compute_dtype)
    y = (jnp.dot(xc, w, preferred_element_type=jnp.float32)
         + b.astype(jnp.float32))
    y = y.astype(compute_dtype)
    return y.astype(jnp.float32) if output_to_fp32 else y


if __name__ == "__main__":
    key = jax.random.PRNGKey(0)
    k1, k2, k3, k4, km = jax.random.split(key, 5)

    def check(name, N, d_in, d_out, key_x, output_to_fp32=True):
        model = NaiveAMPModel(d_in, d_out, output_to_fp32=output_to_fp32,
                              dtype=jnp.bfloat16, key=km)
        x = jax.random.normal(key_x, (N, d_in), dtype=jnp.float32)
        out = jax.block_until_ready(model(x))
        ref = _reference_forward(x, model.w, model.b, model.dtype,
                                 output_to_fp32)
        expect_dtype = jnp.float32 if output_to_fp32 else jnp.bfloat16
        assert out.shape == (N, d_out), (name, out.shape)
        assert out.dtype == expect_dtype, (name, out.dtype)
        assert jnp.allclose(out.astype(jnp.float32), ref.astype(jnp.float32),
                            rtol=2e-2, atol=2e-2), name

    # Single-K fast path, AMP cast fused into the kernel, small shapes.
    check("small", 16, 32, 64, k1)
    # Ragged shapes (exercises cdiv-style padding), single-K path.
    check("ragged", 20, 96, 200, k2)
    # Multi-K accumulate-in-output path + wrapper-side AMP cast (nj > 2).
    check("multik_fp32out", 192, 2304, 384, k3)
    # Multi-K with bf16 output (fp32 VMEM scratch accumulator path).
    check("multik_bf16out", 64, 300, 128, k4, output_to_fp32=False)

    print("KERNEL_OK")
</pallas_src>

<mosaic_0001>
module attributes {stable_mosaic.version = 11 : i64} {
  func.func @_single_k_kernel(%arg0: i32, %arg1: i32, %arg2: memref<128x128xf32, #tpu.memory_space<vmem>>, %arg3: memref<128x128xbf16, #tpu.memory_space<vmem>>, %arg4: memref<1x128xbf16, #tpu.memory_space<vmem>>, %arg5: memref<128x128xf32, #tpu.memory_space<vmem>>) attributes {dimension_semantics = [#tpu.dimension_semantics<parallel>, #tpu.dimension_semantics<parallel>], iteration_bounds = array<i64: 1, 1>, scalar_prefetch = 0 : i64, scratch_operands = 0 : i64, tpu.core_type = #tpu.core_type<tc>, window_params = [{transform_indices = @transform_0, window_bounds = array<i64: 128, 128>}, {transform_indices = @transform_1, window_bounds = array<i64: 128, 128>}, {transform_indices = @transform_2, window_bounds = array<i64: 1, 128>}, {transform_indices = @transform_3, window_bounds = array<i64: 128, 128>}]} {
    %c0 = arith.constant 0 : index
    %c0_0 = arith.constant 0 : index
    %0 = vector.load %arg2[%c0, %c0_0] : memref<128x128xf32, #tpu.memory_space<vmem>>, vector<128x128xf32>
    %1 = arith.truncf %0 : vector<128x128xf32> to vector<128x128xbf16>
    %c0_1 = arith.constant 0 : index
    %c0_2 = arith.constant 0 : index
    %2 = vector.load %arg3[%c0_1, %c0_2] : memref<128x128xbf16, #tpu.memory_space<vmem>>, vector<128x128xbf16>
    %cst = arith.constant dense<0.000000e+00> : vector<128x128xf32>
    %3 = tpu.matmul %1, %2, %cst {dimension_numbers = #tpu.dot_dimension_numbers<[1], [0], [0], [1], [0, 0, 1, 1], [], []>} : vector<128x128xbf16>, vector<128x128xbf16>, vector<128x128xf32> -> vector<128x128xf32>
    %c0_3 = arith.constant 0 : index
    %c0_4 = arith.constant 0 : index
    %4 = vector.load %arg4[%c0_3, %c0_4] : memref<1x128xbf16, #tpu.memory_space<vmem>>, vector<1x128xbf16>
    %5 = arith.extf %4 : vector<1x128xbf16> to vector<1x128xf32>
    %6 = vector.broadcast %5 : vector<1x128xf32> to vector<128x128xf32>
    %7 = arith.addf %3, %6 : vector<128x128xf32>
    %8 = arith.truncf %7 : vector<128x128xf32> to vector<128x128xbf16>
    %9 = arith.extf %8 : vector<128x128xbf16> to vector<128x128xf32>
    %c0_5 = arith.constant 0 : index
    %c0_6 = arith.constant 0 : index
    %10 = vector.load %arg5[%c0_5, %c0_6] : memref<128x128xf32, #tpu.memory_space<vmem>>, vector<128x128xf32>
    tpu.vector_store %arg5[%c0_5, %c0_6], %9 {strides = array<i32>} : memref<128x128xf32, #tpu.memory_space<vmem>>, vector<128x128xf32>,
    return
  }
  func.func @transform_0(%arg0: i32, %arg1: i32) -> (i32, i32) {
    %c0_i32 = arith.constant 0 : i32
    %c0_i32_0 = arith.constant 0 : i32
    return %arg0, %c0_i32 : i32, i32
  }
  func.func @transform_1(%arg0: i32, %arg1: i32) -> (i32, i32) {
    %c0_i32 = arith.constant 0 : i32
    %c0_i32_0 = arith.constant 0 : i32
    return %c0_i32, %arg1 : i32, i32
  }
  func.func @transform_2(%arg0: i32, %arg1: i32) -> (i32, i32) {
    %c0_i32 = arith.constant 0 : i32
    %c0_i32_0 = arith.constant 0 : i32
    return %c0_i32, %arg1 : i32, i32
  }
  func.func @transform_3(%arg0: i32, %arg1: i32) -> (i32, i32) {
    %c0_i32 = arith.constant 0 : i32
    return %arg0, %arg1 : i32, i32
  }
}

</mosaic_0001>

<bundles_post_ra>
// kernel: _amp_linear.1
= control target key start
LH: loop header
LB: loop body
LE: loop exit
PB: predicated region body
PF: predicated region fallthrough
CT: control target
= control target key end

     0   :  { %s431_s1 = inlined_call_operand.vmem [shape: bf16[128,128], index: 1, kind: input, shape index: {}]   ;;  %s432_s0 = inlined_call_operand.vmem [shape: f32[128,128], index: 0, kind: input, shape index: {}]   ;;  %s433_s2 = inlined_call_operand.vmem [shape: bf16[1,128], index: 2, kind: input, shape index: {}]   ;;  %s434_s3 = inlined_call_operand.vmem [shape: f32[128,128], index: 3, kind: output, shape index: {}]  }
   0x1   :  { %v245_v0 = vld [vmem:[%s431_s1 + $0x38] sm:$0xff]  ;;  %v244_v1 = vld [vmem:[%s431_s1 + $0x30] sm:$0xff]  ;;  %v243_v2 = vld [vmem:[%s431_s1 + $0x28] sm:$0xff] }
   0x2   :  { %105 = vmatpush.bf16.msra.mxu0 %v245_v0  ;;  %246 = vmatpush.bf16.msra.mxu1 %v245_v0  ;;  %v242_v3 = vld [vmem:[%s431_s1 + $0x20] sm:$0xff]  ;;  %v241_v4 = vld [vmem:[%s431_s1 + $0x18] sm:$0xff]  ;;  %v240_v5 = vld [vmem:[%s431_s1 + $0x10] sm:$0xff] }
   0x3   :  { %247 = vmatpush.bf16.msra.mxu2 %v245_v0  ;;  %248 = vmatpush.bf16.msra.mxu3 %v245_v0  ;;  %v239_v6 = vld [vmem:[%s431_s1 + $0x8] sm:$0xff]  ;;  %v238_v7 = vld [vmem:[%s431_s1] sm:$0xff]  ;;  %v16_v20 = vld [vmem:[%s432_s0 + $0x10] sm:$0xff] }
   0x4   :  { %v14_v8 = vld [vmem:[%s432_s0] sm:$0xff]  ;;  %v15_v9 = vld [vmem:[%s432_s0 + $0x8] sm:$0xff]  ;;  %v17_v21 = vld [vmem:[%s432_s0 + $0x18] sm:$0xff] }
   0x5   :  { %v18_v10 = vld [vmem:[%s432_s0 + $0x20] sm:$0xff]  ;;  %v19_v11 = vld [vmem:[%s432_s0 + $0x28] sm:$0xff]  ;;  %v30_v16 = vpack.c.bf16 %v15_v9, %v14_v8  ;;  %v20_v22 = vld [vmem:[%s432_s0 + $0x30] sm:$0xff]  ;;  %v31_v28 = vpack.c.bf16 %v17_v21, %v16_v20 }
   0x6   :  { %106 = vmatpush.bf16.msra.mxu0 %v244_v1  ;;  %249 = vmatpush.bf16.msra.mxu1 %v244_v1  ;;  %v22_v12 = vld [vmem:[%s432_s0 + $0x40] sm:$0xff]  ;;  %v23_v13 = vld [vmem:[%s432_s0 + $0x48] sm:$0xff]  ;;  %v32_v17 = vpack.c.bf16 %v19_v11, %v18_v10  ;;  %v21_v23 = vld [vmem:[%s432_s0 + $0x38] sm:$0xff] }
   0x7   :  { %250 = vmatpush.bf16.msra.mxu2 %v244_v1  ;;  %251 = vmatpush.bf16.msra.mxu3 %v244_v1  ;;  %v26_v14 = vld [vmem:[%s432_s0 + $0x60] sm:$0xff]  ;;  %v27_v15 = vld [vmem:[%s432_s0 + $0x68] sm:$0xff]  ;;  %v34_v18 = vpack.c.bf16 %v23_v13, %v22_v12  ;;  %v24_v24 = vld [vmem:[%s432_s0 + $0x50] sm:$0xff]  ;;  %v33_v29 = vpack.c.bf16 %v21_v23, %v20_v22 }
   0x8   :  { %v36_v19 = vpack.c.bf16 %v27_v15, %v26_v14  ;;  %v25_v25 = vld [vmem:[%s432_s0 + $0x58] sm:$0xff]  ;;  %v28_v26 = vld [vmem:[%s432_s0 + $0x70] sm:$0xff]  ;;  %v54_v32 = vld [vmem:[%s433_s2] sm:$0x1] }
   0x9   :  { %v29_v27 = vld [vmem:[%s432_s0 + $0x78] sm:$0xff]  ;;  %v35_v30 = vpack.c.bf16 %v25_v25, %v24_v24  ;;  %v55_v33 = vunpack.c.l.bf16 %v54_v32 }
   0xa   :  { %107 = vmatpush.bf16.msra.mxu0 %v243_v2  ;;  %252 = vmatpush.bf16.msra.mxu1 %v243_v2  ;;  %v37_v31 = vpack.c.bf16 %v29_v27, %v28_v26 }
   0xb   :  { %253 = vmatpush.bf16.msra.mxu2 %v243_v2  ;;  %254 = vmatpush.bf16.msra.mxu3 %v243_v2  ;;  %v365_v34 = vperm.slane %v55_v33, 0 }
   0xe   :  { %108 = vmatpush.bf16.msra.mxu0 %v242_v3  ;;  %255 = vmatpush.bf16.msra.mxu1 %v242_v3 }
   0xf   :  { %256 = vmatpush.bf16.msra.mxu2 %v242_v3  ;;  %257 = vmatpush.bf16.msra.mxu3 %v242_v3 }
  0x12   :  { %109 = vmatpush.bf16.msra.mxu0 %v241_v4  ;;  %258 = vmatpush.bf16.msra.mxu1 %v241_v4 }
  0x13   :  { %259 = vmatpush.bf16.msra.mxu2 %v241_v4  ;;  %260 = vmatpush.bf16.msra.mxu3 %v241_v4 }
  0x16   :  { %110 = vmatpush.bf16.msra.mxu0 %v240_v5  ;;  %261 = vmatpush.bf16.msra.mxu1 %v240_v5 }
  0x17   :  { %262 = vmatpush.bf16.msra.mxu2 %v240_v5  ;;  %263 = vmatpush.bf16.msra.mxu3 %v240_v5 }
  0x1a   :  { %111 = vmatpush.bf16.msra.mxu0 %v239_v6  ;;  %264 = vmatpush.bf16.msra.mxu1 %v239_v6 }
  0x1b   :  { %265 = vmatpush.bf16.msra.mxu2 %v239_v6  ;;  %266 = vmatpush.bf16.msra.mxu3 %v239_v6 }
  0x1e   :  { %112 = vmatpush.bf16.msra.mxu0 %v238_v7  ;;  %267 = vmatpush.bf16.msra.mxu1 %v238_v7 }
  0x1f   :  { %268 = vmatpush.bf16.msra.mxu2 %v238_v7  ;;  %269 = vmatpush.bf16.msra.mxu3 %v238_v7 }
  0x21   :  { %113 = vmatmul.bf16.vlgmr.msra.gmra.mxu0 %v30_v16  ;;  %123 = vmatmul.bf16.vlgmr.msra.gmra.mxu1 %v32_v17 }
  0x22   :  { %133 = vmatmul.bf16.vlgmr.msra.gmra.mxu2 %v34_v18  ;;  %143 = vmatmul.bf16.vlgmr.msra.gmra.mxu3 %v36_v19 }
  0x31   :  { %118 = vmatmul.bf16.gmra.mxu0 %v31_v28  ;;  %128 = vmatmul.bf16.gmra.mxu1 %v33_v29 }
  0x32   :  { %138 = vmatmul.bf16.gmra.mxu2 %v35_v30  ;;  %148 = vmatmul.bf16.gmra.mxu3 %v37_v31 }
  0x9e   :  { %v114_v35 = vpop.f32.mrf.mxu0  ;;  %v124_v36 = vpop.f32.mrf.mxu1 }
  0x9f   :  { %v115_v37 = vadd.f32 %v114_v35, %v365_v34  ;;  %v125_v38 = vadd.f32 %v124_v36, %v365_v34 }
  0xa1   :  { %v154_v39 = vpack.c.bf16 %v115_v37, %v115_v37  ;;  %v158_v40 = vpack.c.bf16 %v125_v38, %v125_v38 }
  0xa3   :  { %v170_v41 = vunpack.c.l.bf16 %v154_v39  ;;  %v174_v42 = vunpack.c.l.bf16 %v158_v40 }
  0xa5   :  { %186 = vst [vmem:[%s434_s3] sm:$0xff] %v170_v41  ;;  %v134_v43 = vpop.f32.mrf.mxu2  ;;  %v144_v44 = vpop.f32.mrf.mxu3 }
  0xa6   :  { %190 = vst [vmem:[%s434_s3 + $0x20] sm:$0xff] %v174_v42  ;;  %v135_v45 = vadd.f32 %v134_v43, %v365_v34  ;;  %v145_v46 = vadd.f32 %v144_v44, %v365_v34  ;;  %v116_v47 = vpop.f32.mrf.mxu0  ;;  %v126_v48 = vpop.f32.mrf.mxu1 }
  0xa7   :  { %v117_v49 = vadd.f32 %v116_v47, %v365_v34  ;;  %v127_v50 = vadd.f32 %v126_v48, %v365_v34 }
  0xa8   :  { %v162_v51 = vpack.c.bf16 %v135_v45, %v135_v45  ;;  %v166_v52 = vpack.c.bf16 %v145_v46, %v145_v46 }
  0xa9   :  { %v155_v53 = vpack.c.bf16 %v117_v49, %v117_v49  ;;  %v159_v54 = vpack.c.bf16 %v127_v50, %v127_v50 }
  0xaa   :  { %v178_v55 = vunpack.c.l.bf16 %v162_v51  ;;  %v182_v56 = vunpack.c.l.bf16 %v166_v52 }
  0xab   :  { %v171_v57 = vunpack.c.l.bf16 %v155_v53  ;;  %v175_v58 = vunpack.c.l.bf16 %v159_v54 }
  0xac   :  { %194 = vst [vmem:[%s434_s3 + $0x40] sm:$0xff] %v178_v55 }
  0xad   :  { %198 = vst [vmem:[%s434_s3 + $0x60] sm:$0xff] %v182_v56  ;;  %v136_v59 = vpop.f32.mrf.mxu2  ;;  %v146_v60 = vpop.f32.mrf.mxu3 }
  0xae   :  { %187 = vst [vmem:[%s434_s3 + $0x8] sm:$0xff] %v171_v57  ;;  %v137_v61 = vadd.f32 %v136_v59, %v365_v34  ;;  %v147_v62 = vadd.f32 %v146_v60, %v365_v34  ;;  %v119_v63 = vpop.f32.mrf.mxu0  ;;  %v129_v0 = vpop.f32.mrf.mxu1 }
  0xaf   :  { %191 = vst [vmem:[%s434_s3 + $0x28] sm:$0xff] %v175_v58  ;;  %v120_v1 = vadd.f32 %v119_v63, %v365_v34  ;;  %v130_v2 = vadd.f32 %v129_v0, %v365_v34 }
  0xb0   :  { %v163_v3 = vpack.c.bf16 %v137_v61, %v137_v61  ;;  %v167_v4 = vpack.c.bf16 %v147_v62, %v147_v62 }
  0xb1   :  { %v156_v5 = vpack.c.bf16 %v120_v1, %v120_v1  ;;  %v160_v6 = vpack.c.bf16 %v130_v2, %v130_v2 }
  0xb2   :  { %v179_v7 = vunpack.c.l.bf16 %v163_v3  ;;  %v183_v8 = vunpack.c.l.bf16 %v167_v4 }
  0xb3   :  { %v172_v9 = vunpack.c.l.bf16 %v156_v5  ;;  %v176_v10 = vunpack.c.l.bf16 %v160_v6 }
  0xb4   :  { %195 = vst [vmem:[%s434_s3 + $0x48] sm:$0xff] %v179_v7 }
  0xb5   :  { %199 = vst [vmem:[%s434_s3 + $0x68] sm:$0xff] %v183_v8  ;;  %v139_v11 = vpop.f32.mrf.mxu2  ;;  %v149_v12 = vpop.f32.mrf.mxu3 }
  0xb6   :  { %188 = vst [vmem:[%s434_s3 + $0x10] sm:$0xff] %v172_v9  ;;  %v140_v13 = vadd.f32 %v139_v11, %v365_v34  ;;  %v150_v14 = vadd.f32 %v149_v12, %v365_v34  ;;  %v121_v15 = vpop.f32.mrf.mxu0  ;;  %v131_v16 = vpop.f32.mrf.mxu1 }
  0xb7   :  { %192 = vst [vmem:[%s434_s3 + $0x30] sm:$0xff] %v176_v10  ;;  %v122_v17 = vadd.f32 %v121_v15, %v365_v34  ;;  %v132_v18 = vadd.f32 %v131_v16, %v365_v34 }
  0xb8   :  { %v164_v19 = vpack.c.bf16 %v140_v13, %v140_v13  ;;  %v168_v20 = vpack.c.bf16 %v150_v14, %v150_v14 }
  0xb9   :  { %v157_v21 = vpack.c.bf16 %v122_v17, %v122_v17  ;;  %v161_v22 = vpack.c.bf16 %v132_v18, %v132_v18 }
  0xba   :  { %v180_v23 = vunpack.c.l.bf16 %v164_v19  ;;  %v184_v24 = vunpack.c.l.bf16 %v168_v20 }
  0xbb   :  { %v173_v25 = vunpack.c.l.bf16 %v157_v21  ;;  %v177_v26 = vunpack.c.l.bf16 %v161_v22 }
  0xbc   :  { %196 = vst [vmem:[%s434_s3 + $0x50] sm:$0xff] %v180_v23 }
  0xbd   :  { %200 = vst [vmem:[%s434_s3 + $0x70] sm:$0xff] %v184_v24  ;;  %v141_v27 = vpop.f32.mrf.mxu2  ;;  %v151_v28 = vpop.f32.mrf.mxu3 }
  0xbe   :  { %189 = vst [vmem:[%s434_s3 + $0x18] sm:$0xff] %v173_v25  ;;  %v142_v29 = vadd.f32 %v141_v27, %v365_v34  ;;  %v152_v30 = vadd.f32 %v151_v28, %v365_v34 }
  0xbf   :  { %193 = vst [vmem:[%s434_s3 + $0x38] sm:$0xff] %v177_v26 }
  0xc0   :  { %v165_v31 = vpack.c.bf16 %v142_v29, %v142_v29  ;;  %v169_v32 = vpack.c.bf16 %v152_v30, %v152_v30 }
  0xc2   :  { %v181_v33 = vunpack.c.l.bf16 %v165_v31  ;;  %v185_v35 = vunpack.c.l.bf16 %v169_v32 }
  0xc4   :  { %197 = vst [vmem:[%s434_s3 + $0x58] sm:$0xff] %v181_v33 }
  0xc5   :  { %201 = vst [vmem:[%s434_s3 + $0x78] sm:$0xff] %v185_v35 }

</bundles_post_ra>
